<compile_context>
chip_gen: v7x
topology: tpu7x:2x2x1
jax: 0.10.0
libtpu: 0.0.40
codegen_flags: <defaults>
</compile_context>

<pallas_src>
import functools

import jax
import jax.numpy as jnp
from jax.experimental import pallas as pl
from jax.experimental.pallas import tpu as pltpu
import numpy as np

ALPHA = 0.5
EPS = 1e-10

# small test shape: (batch, seq, vocab); vocab chosen lane-dense (multiple of 128)
B, S, V = 2, 8, 128


# ----------------------------- kernel ----------------------------------------
def hybrid_activation_kernel(x_ref, o_ref, *, alpha):
    x = x_ref[...].astype(jnp.float32)                      # (rows_blk, V)

    # --- ReLU-bounded branch (elementwise; log1p/tanh lower to the EUP) ------
    scale = jnp.log1p(jnp.maximum(x, 0.0))
    bounded = jnp.tanh(x / (1.0 + scale))
    relu_probs = (bounded + 1.0) * 0.5

    # --- softmax branch (row-wise; full vocab resident in this block) --------
    m = jnp.max(x, axis=-1, keepdims=True)
    e = jnp.exp(x - m)
    inv_denom = pl.reciprocal(jnp.sum(e, axis=-1, keepdims=True), approx=True)
    soft_probs = e * inv_denom

    # --- mix and renormalize (exact division; keeps the +1e-10 semantics) ----
    combined = alpha * relu_probs + (1.0 - alpha) * soft_probs
    norm = jnp.sum(combined, axis=-1, keepdims=True) + EPS
    o_ref[...] = (combined / norm).astype(o_ref.dtype)


# ----------------------------- wrapper ----------------------------------------
def hybrid_relu_bounded_activation(x, alpha=ALPHA):
    """Pallas forward for HybridReLUBoundedActivation2.  x: (..., V)."""
    orig_shape = x.shape
    v = orig_shape[-1]
    x2d = x.reshape(-1, v)                                   # lane-dense slab
    rows = x2d.shape[0]

    # Single grid step when everything comfortably fits VMEM; otherwise tile
    # rows in large lane-dense blocks (keeps per-step overhead amortized).
    # TODO(synk): pad `rows` for row counts not divisible by the block size.
    block_rows = rows if rows <= 1024 else 512
    assert rows % block_rows == 0, "row count must divide the row tile"
    grid = (rows // block_rows,)

    out = pl.pallas_call(
        functools.partial(hybrid_activation_kernel, alpha=alpha),
        out_shape=jax.ShapeDtypeStruct((rows, v), x.dtype),
        grid_spec=pltpu.PrefetchScalarGridSpec(
            num_scalar_prefetch=0,
            grid=grid,
            in_specs=[pl.BlockSpec((block_rows, v), lambda i: (i, 0))],
            out_specs=pl.BlockSpec((block_rows, v), lambda i: (i, 0)),
        ),
        compiler_params=pltpu.CompilerParams(
            dimension_semantics=("parallel",)),
    )(x2d)
    return out.reshape(orig_shape)


# ----------------------------- reference (plain JAX) --------------------------
def ref_forward(x, alpha=ALPHA):
    scale = jnp.log1p(jax.nn.relu(x))
    bounded = jnp.tanh(x / (1.0 + scale))
    relu_probs = (bounded + 1.0) / 2.0
    soft_probs = jax.nn.softmax(x, axis=-1)
    combined = alpha * relu_probs + (1.0 - alpha) * soft_probs
    return combined / (jnp.sum(combined, axis=-1, keepdims=True) + EPS)


# ----------------------------- main -------------------------------------------
if __name__ == "__main__":
    key = jax.random.PRNGKey(0)
    # logits-like inputs with a moderate spread
    x = 2.0 * jax.random.normal(key, (B, S, V), dtype=jnp.float32)

    out = hybrid_relu_bounded_activation(x)
    out = jax.block_until_ready(out)

    ref = jax.block_until_ready(ref_forward(x))
    # approx=True reciprocal in the softmax denominator -> slightly relaxed rtol
    np.testing.assert_allclose(np.asarray(out), np.asarray(ref),
                               atol=1e-5, rtol=1e-3)
    # sanity: rows sum to ~1 (it is a renormalized probability distribution)
    np.testing.assert_allclose(np.asarray(out).sum(-1), 1.0, atol=1e-5)
    print("KERNEL_OK")
</pallas_src>

<mosaic_0001>
module attributes {stable_mosaic.version = 11 : i64} {
  func.func @hybrid_activation_kernel(%arg0: i32, %arg1: memref<16x128xf32, #tpu.memory_space<vmem>>, %arg2: memref<16x128xf32, #tpu.memory_space<vmem>>) attributes {dimension_semantics = [#tpu.dimension_semantics<parallel>], iteration_bounds = array<i64: 1>, scalar_prefetch = 0 : i64, scratch_operands = 0 : i64, tpu.core_type = #tpu.core_type<tc>, window_params = [{transform_indices = @transform_0, window_bounds = array<i64: 16, 128>}, {transform_indices = @transform_1, window_bounds = array<i64: 16, 128>}]} {
    %c0 = arith.constant 0 : index
    %c0_0 = arith.constant 0 : index
    %0 = vector.load %arg1[%c0, %c0_0] : memref<16x128xf32, #tpu.memory_space<vmem>>, vector<16x128xf32>
    %cst = arith.constant 0.000000e+00 : f32
    %1 = vector.broadcast %cst : f32 to vector<16x128xf32>
    %2 = arith.maximumf %0, %1 : vector<16x128xf32>
    %3 = math.log1p %2 : vector<16x128xf32>
    %cst_1 = arith.constant 1.000000e+00 : f32
    %4 = vector.broadcast %cst_1 : f32 to vector<16x128xf32>
    %5 = arith.addf %4, %3 : vector<16x128xf32>
    %6 = arith.divf %0, %5 : vector<16x128xf32>
    %7 = math.tanh %6 : vector<16x128xf32>
    %cst_2 = arith.constant 1.000000e+00 : f32
    %8 = vector.broadcast %cst_2 : f32 to vector<16x128xf32>
    %9 = arith.addf %7, %8 : vector<16x128xf32>
    %cst_3 = arith.constant 5.000000e-01 : f32
    %10 = vector.broadcast %cst_3 : f32 to vector<16x128xf32>
    %11 = arith.mulf %9, %10 : vector<16x128xf32>
    %cst_4 = arith.constant dense<0xFF800000> : vector<16xf32>
    %12 = vector.multi_reduction <maximumf>, %0, %cst_4 [1] : vector<16x128xf32> to vector<16xf32>
    %13 = vector.shape_cast %12 : vector<16xf32> to vector<16x1xf32>
    %14 = vector.broadcast %13 : vector<16x1xf32> to vector<16x128xf32>
    %15 = arith.subf %0, %14 : vector<16x128xf32>
    %16 = math.exp %15 : vector<16x128xf32>
    %cst_5 = arith.constant dense<0.000000e+00> : vector<16xf32>
    %17 = vector.multi_reduction <add>, %16, %cst_5 [1] : vector<16x128xf32> to vector<16xf32>
    %18 = vector.shape_cast %17 : vector<16xf32> to vector<16x1xf32>
    %19 = tpu.reciprocal %18 {approx = true} : vector<16x1xf32> -> vector<16x1xf32>
    %20 = vector.broadcast %19 : vector<16x1xf32> to vector<16x128xf32>
    %21 = arith.mulf %16, %20 : vector<16x128xf32>
    %cst_6 = arith.constant 5.000000e-01 : f32
    %22 = vector.broadcast %cst_6 : f32 to vector<16x128xf32>
    %23 = arith.mulf %22, %11 : vector<16x128xf32>
    %cst_7 = arith.constant 5.000000e-01 : f32
    %24 = vector.broadcast %cst_7 : f32 to vector<16x128xf32>
    %25 = arith.mulf %24, %21 : vector<16x128xf32>
    %26 = arith.addf %23, %25 : vector<16x128xf32>
    %cst_8 = arith.constant dense<0.000000e+00> : vector<16xf32>
    %27 = vector.multi_reduction <add>, %26, %cst_8 [1] : vector<16x128xf32> to vector<16xf32>
    %28 = vector.shape_cast %27 : vector<16xf32> to vector<16x1xf32>
    %cst_9 = arith.constant 1.000000e-10 : f32
    %29 = vector.broadcast %cst_9 : f32 to vector<16x1xf32>
    %30 = arith.addf %28, %29 : vector<16x1xf32>
    %31 = vector.broadcast %30 : vector<16x1xf32> to vector<16x128xf32>
    %32 = arith.divf %26, %31 : vector<16x128xf32>
    %c0_10 = arith.constant 0 : index
    %c0_11 = arith.constant 0 : index
    %33 = vector.load %arg2[%c0_10, %c0_11] : memref<16x128xf32, #tpu.memory_space<vmem>>, vector<16x128xf32>
    tpu.vector_store %arg2[%c0_10, %c0_11], %32 {strides = array<i32>} : memref<16x128xf32, #tpu.memory_space<vmem>>, vector<16x128xf32>,
    return
  }
  func.func @transform_0(%arg0: i32) -> (i32, i32) {
    %c0_i32 = arith.constant 0 : i32
    %c0_i32_0 = arith.constant 0 : i32
    return %arg0, %c0_i32 : i32, i32
  }
  func.func @transform_1(%arg0: i32) -> (i32, i32) {
    %c0_i32 = arith.constant 0 : i32
    %c0_i32_0 = arith.constant 0 : i32
    return %arg0, %c0_i32 : i32, i32
  }
}

</mosaic_0001>

<bundles_post_ra>
// kernel: tpu_custom_call.1
= control target key start
LH: loop header
LB: loop body
LE: loop exit
PB: predicated region body
PF: predicated region fallthrough
CT: control target
= control target key end

     0   :  { %6 = vsyncpa [#allocation3], 0  ;;  %s230_s0 = inlined_call_operand.hbm [shape: f32[16,128], index: 0, kind: input, shape index: {}]   ;;  %s231_s1 = inlined_call_operand.hbm [shape: f32[16,128], index: 1, kind: output, shape index: {}]  }
   0x1   :  { %7 = vsyncpa [#allocation4], 0  ;;  %s186_s6 = smov [#allocation2]   ;;  %s138_s10 = scalar_lea.hbm %s230_s0, 256 }
   0x2   :  { %s13_s7 = sshll.u32 %s186_s6, 4  ;;  %p139_p0 = scmp.ne.s32.totalorder %s230_s0, %s138_s10  ;;  %s14_s7 = int_to_ptr.vmem [resolvable:$true] %s13_s7 }
   0x3   :  { %p142_p1 = scmp.lt.u32.totalorder %s138_s10, %s230_s0 }
   0x5   :  { %p144_p2 = pnand %p142_p1, %p139_p0 }
   0x7   :  { %147 = shalt.err (!%p144_p2)
}
   0x8   :  { %s148_s15 = scalar_lea.vmem %s14_s7, 256  ;;  %p153_p4 = scmp.lt.s32.totalorder %s14_s7, %s14_s7 }
   0x9   :  { %p149_p3 = scmp.ne.s32.totalorder %s14_s7, %s148_s15  ;;  %p154_p5 = scmp.lt.s32.totalorder %s148_s15, %s148_s15 }
   0xb   :  { %p155_p6 = por %p154_p5, %p153_p4 }
   0xd   :  { %p156_p7 = pnand %p155_p6, %p149_p3 }
   0xf   :  { %159 = shalt.err (!%p156_p7)
}
  0x10   :  { %s187_s16 = smov 128   ;;  %s188_s17 = smov 8  }
  0x11   :  { %19 = dma.hbm_to_vmem [thread:$0]  %s230_s0, 256, %s14_s7, [#allocation3], %s187_s16, %s187_s16, %s188_s17  }
  0x12   :  { %182 = dma.done.wait [#allocation3], 256  }
  0x13   :  { %183 = vsyncadd [#allocation3], 4294967040  ;;  %v23_v0 = vld [vmem:[#allocation2] sm:$0xff]  ;;  %v24_v1 = vld [vmem:[#allocation2 + $0x8] sm:$0xff]  ;;  %s189_s0 = smov [#allocation5]  }
  0x14   :  { %57 = vmax.xlane.f32.xlu0 %v23_v0  ;;  %v25_v10 = vmax.f32 %v23_v0, 0.0  ;;  %v26_v12 = vmax.f32 %v24_v1, 0.0  ;;  %s98_s20 = sshll.u32 %s189_s0, 4  ;;  %s99_s20 = int_to_ptr.vmem [resolvable:$true] %s98_s20 }
  0x15   :  { %s160_s21 = scalar_lea.vmem %s99_s20, 256  ;;  %p165_p9 = scmp.lt.s32.totalorder %s99_s20, %s99_s20 }
  0x16   :  { %v27_v11 = vadd.f32 1.0, %v25_v10  ;;  %v36_v13 = vadd.f32 1.0, %v26_v12  ;;  %v30_v14 = vmul.f32 -0.5, %v25_v10  ;;  %v39_v16 = vmul.f32 -0.5, %v26_v12  ;;  %p161_p8 = scmp.ne.s32.totalorder %s99_s20, %s160_s21  ;;  %p166_p10 = scmp.lt.s32.totalorder %s160_s21, %s160_s21 }
  0x17   :  { %v33_v18 = vand.u32 2147483647, %v25_v10  ;;  %v42_v23 = vand.u32 2147483647, %v26_v12 }
  0x18   :  { %59 = vmax.xlane.f32.xlu0 %v24_v1  ;;  %v31_v15 = vadd.f32 1.0, %v30_v14  ;;  %v40_v21 = vadd.f32 1.0, %v39_v16  ;;  %p167_p11 = por %p166_p10, %p165_p9 }
  0x19   :  { %vm34_vm0 = vcmp.lt.f32.partialorder %v33_v18, 0.0004427343  ;;  %vm43_vm1 = vcmp.lt.f32.partialorder %v42_v23, 0.0004427343 }
  0x1a   :  { %v32_v20 = vmul.f32 %v31_v15, %v25_v10  ;;  %v41_v26 = vmul.f32 %v40_v21, %v26_v12  ;;  %p168_p12 = pnand %p167_p11, %p161_p8 }
  0xa1   :  { %v58_v2 = vpop.xlane.xlu0 %57 }
  0xa2   :  { %v61_v3 = vsub.f32 %v23_v0, %v58_v2 }
  0xa4   :  { %v63_v4 = vmul.f32 1.442695, %v61_v3 }
  0xa5   :  { %v60_v5 = vpop.xlane.xlu0 %59 }
  0xa6   :  { %114 = vpow2.f32 %v63_v4  ;;  %v62_v6 = vsub.f32 %v24_v1, %v60_v5 }
  0xa8   :  { %v65_v7 = vmul.f32 1.442695, %v62_v6 }
  0xaa   :  { %116 = vpow2.f32 %v65_v7 }
  0xab   :  { %118 = vlog2.f32 %v27_v11 }
  0xac   :  { %120 = vlog2.f32 %v36_v13 }
  0xb0   :  { %v115_v8 = vpop.eup %114 }
  0xb1   :  { %67 = vadd.xlane.f32.xlu1 %v115_v8 }
  0xb4   :  { %v117_v9 = vpop.eup %116 }
  0xb5   :  { %69 = vadd.xlane.f32.xlu1 %v117_v9  ;;  %v119_v17 = vpop.eup %118 }
  0xb6   :  { %v29_v19 = vmul.f32 0.6931472, %v119_v17  ;;  %v121_v22 = vpop.eup %120 }
  0xb7   :  { %v38_v25 = vmul.f32 0.6931472, %v121_v22 }
  0xb8   :  { %v35_v24 = vsel %vm34_vm0, %v32_v20, %v29_v19 }
  0xb9   :  { %v45_v27 = vadd.f32 1.0, %v35_v24  ;;  %v44_v28 = vsel %vm43_vm1, %v41_v26, %v38_v25 }
  0xba   :  { %v46_v29 = vadd.f32 1.0, %v44_v28 }
  0xbb   :  { %122 = vrcp.f32 %v45_v27 }
  0xbc   :  { %124 = vrcp.f32 %v46_v29 }
  0xc5   :  { %v123_v30 = vpop.eup %122 }
  0xc6   :  { %v48_v31 = vmul.f32 %v123_v30, %v23_v0  ;;  %v125_v32 = vpop.eup %124 }
  0xc7   :  { %v50_v33 = vmul.f32 %v125_v32, %v24_v1 }
  0xc8   :  { %126 = vtanh.f32 %v48_v31 }
  0xc9   :  { %128 = vtanh.f32 %v50_v33 }
  0xd2   :  { %v127_v35 = vpop.eup %126 }
  0xd3   :  { %v53_v37 = vadd.f32 1.0, %v127_v35  ;;  %v129_v38 = vpop.eup %128 }
  0xd4   :  { %v54_v40 = vadd.f32 1.0, %v129_v38 }
  0xd5   :  { %v55_v39 = vmul.f32 0.5, %v53_v37 }
  0xd6   :  { %v56_v44 = vmul.f32 0.5, %v54_v40 }
  0xd7   :  { %v75_v43 = vmul.f32 0.5, %v55_v39 }
  0xd8   :  { %v76_v49 = vmul.f32 0.5, %v56_v44 }
 0x13e   :  { %v68_v34 = vpop.xlane.xlu1 %67 }
 0x13f   :  { %130 = vrcp.f32 %v68_v34 }
 0x142   :  { %v70_v36 = vpop.xlane.xlu1 %69 }
 0x143   :  { %132 = vrcp.f32 %v70_v36 }
 0x149   :  { %v131_v41 = vpop.eup %130 }
 0x14a   :  { %v73_v42 = vmul.f32 %v131_v41, %v115_v8 }
 0x14c   :  { %v77_v45 = vmul.f32 0.5, %v73_v42 }
 0x14d   :  { %v133_v46 = vpop.eup %132 }
 0x14e   :  { %v79_v47 = vadd.f32 %v77_v45, %v75_v43  ;;  %v74_v48 = vmul.f32 %v133_v46, %v117_v9 }
 0x150   :  { %81 = vadd.xlane.f32.xlu0 %v79_v47  ;;  %v78_v50 = vmul.f32 0.5, %v74_v48 }
 0x152   :  { %v80_v51 = vadd.f32 %v78_v50, %v76_v49 }
 0x154   :  { %83 = vadd.xlane.f32.xlu1 %v80_v51 }
 0x1dd   :  { %v82_v52 = vpop.xlane.xlu0 %81 }
 0x1de   :  { %v85_v53 = vadd.f32 1e-10, %v82_v52 }
 0x1e0   :  { %134 = vrcp.f32 %v85_v53 }
 0x1e1   :  { %v84_v54 = vpop.xlane.xlu1 %83 }
 0x1e2   :  { %v86_v55 = vadd.f32 1e-10, %v84_v54 }
 0x1e4   :  { %136 = vrcp.f32 %v86_v55 }
 0x1ea   :  { %v135_v56 = vpop.eup %134 }
 0x1eb   :  { %v88_v57 = vmul.f32 %v135_v56, %v79_v47 }
 0x1ed   :  { %91 = vst [vmem:[#allocation5] sm:$0xff] %v88_v57 }
 0x1ee   :  { %v137_v58 = vpop.eup %136 }
 0x1ef   :  { %v90_v59 = vmul.f32 %v137_v58, %v80_v51 }
 0x1f1   :  { %92 = vst [vmem:[#allocation5 + $0x8] sm:$0xff] %v90_v59 }
 0x1f2   :  { %171 = shalt.err (!%p168_p12)
}
 0x1f3   :  { %s172_s24 = scalar_lea.hbm %s231_s1, 256 }
 0x1f4   :  { %p173_p13 = scmp.ne.s32.totalorder %s231_s1, %s172_s24  ;;  %p176_p0 = scmp.lt.u32.totalorder %s172_s24, %s231_s1 }
 0x1f6   :  { %p178_p1 = pnand %p176_p0, %p173_p13 }
 0x1f8   :  { %181 = shalt.err (!%p178_p1)
}
 0x1f9   :  { %104 = dma.vmem_to_hbm [thread:$0]  %s99_s20, 256, %s231_s1, [#allocation4], %s187_s16, %s187_s16, %s188_s17  }
 0x1fa   :  { %184 = dma.done.wait [#allocation4], 256  }
 0x1fb   :  { %185 = vsyncadd [#allocation4], 4294967040 }
 0x1fc   :  { %108 = vsyncpa [#allocation3], 1 }
 0x1fd   :  { %109 = vsyncpa [#allocation4], 1 }

</bundles_post_ra>
